<compile_context>
chip_gen: v5e
topology: v5e:2x2
jax: 0.10.0
libtpu: 0.0.40
codegen_flags: <defaults>
</compile_context>

<pallas_src>
import jax
import jax.numpy as jnp
from jax.experimental import pallas as pl
from jax.experimental.pallas import tpu as pltpu

EPS = 1e-5
K = 3  # ksize


def alpr_res_block(x_nhwc, w1, g1, b1, w2, g2a, b2a, g2b, b2b):
    """x_nhwc: (N,H,W,C); w1/w2: (K,K,Cin,Cout) HWIO; gammas/betas: (Cout,).

    Note: b2a (main_conv's BN beta) cancels exactly in training mode because the
    following main_bn subtracts its batch mean; accepted for API fidelity only.
    """
    N, H, W, C = x_nhwc.shape
    assert w1.shape[-1] == C and w2.shape[-1] == C  # residual needs in_c == out_c
    assert W > 0 and (W & (W - 1)) == 0, "lane roll-reduce assumes W is a power of two"
    WC = W * C
    R = N * H
    inv_count = 1.0 / float(N * H * W)

    # ---------------- wrapper-side layout plumbing (free) ----------------
    # Lane-dense activations: (N*H, W*C); W*C = 128 -> full f32 vregs.
    x_p = x_nhwc.astype(jnp.float32).reshape(R, WC)

    # Banded conv weights, all K dy-taps concatenated along the contraction axis:
    # rows ordered (dy, wi, ci); Bcat[dy*WC + wi*C + ci, wo*C + co] = w[dy, wi-wo+1, ci, co]
    # (zero outside the 3-wide band => 'same' padding along W is built in).
    def band(w):
        dx = jnp.arange(K)
        wi = jnp.arange(W)
        wo = jnp.arange(W)
        mask = (wi[None, :, None] == wo[None, None, :] + dx[:, None, None] - 1)
        mask = mask.astype(jnp.float32)                       # (K, W, W): (dx, wi, wo)
        b5 = jnp.einsum('xwv,yxio->ywivo', mask, w.astype(jnp.float32))
        return b5.reshape(K * WC, WC)                         # (3*W*Cin, W*Cout)

    B1 = band(w1)
    B2 = band(w2)

    # Lane-tiled per-channel BN params packed into one aligned (8, WC) tile:
    # rows 0..4 = g1, b1, g2a, g2b, b2b (value at lane w*C+c is param[c]).
    def tile_l(v):
        return jnp.tile(v.astype(jnp.float32).reshape(1, C), (1, W))  # (1, WC)

    params = jnp.concatenate(
        [tile_l(g1), tile_l(b1), tile_l(g2a), tile_l(g2b), tile_l(b2b),
         jnp.zeros((3, WC), jnp.float32)], axis=0)            # (8, WC)

    # ---------------------------- kernel ----------------------------
    def kernel(x_ref, w1_ref, w2_ref, p_ref, out_ref):
        x = x_ref[...]                                        # (R, WC), aligned load
        p = p_ref[...]                                        # (8, WC)
        g1_l, b1_l = p[0:1, :], p[1:2, :]
        g2a_l, g2b_l, b2b_l = p[2:3, :], p[3:4, :], p[4:5, :]

        # Per-image boundary masks for the H 'same' padding (computed once).
        ri = jax.lax.broadcasted_iota(jnp.int32, (R, WC), 0)
        top = (ri % H) == 0            # first row of each image: no h-1 neighbour
        bot = (ri % H) == (H - 1)      # last row of each image: no h+1 neighbour

        def conv(v, w_ref):
            # dy-shifted operands via XLU row rolls + boundary masking; one deep
            # matmul with contraction depth 3*WC folds all taps + channel sum.
            prev = jnp.where(top, 0.0, pltpu.roll(v, 1, axis=0))       # row h-1
            nxt = jnp.where(bot, 0.0, pltpu.roll(v, R - 1, axis=0))    # row h+1
            lhs = jnp.concatenate([prev, v, nxt], axis=1)              # (R, 3*WC)
            return jnp.dot(lhs, w_ref[...], preferred_element_type=jnp.float32)

        def group_bcast(t):
            # Channel-grouped sum over the W lane groups, broadcast back to every
            # lane, via log2(W) lane rolls (no MXU).
            s = C
            while s < WC:
                t = t + pltpu.roll(t, s, axis=1)
                s *= 2
            return t

        def batch_stats(v):
            # Two-pass (centered) mean / biased variance per channel, lane-tiled.
            mean = group_bcast(jnp.sum(v, axis=0, keepdims=True)) * inv_count
            d = v - mean
            var = group_bcast(jnp.sum(d * d, axis=0, keepdims=True)) * inv_count
            return mean, var

        # ---- skip_conv: conv -> BN(train) -> ReLU ----
        acc1 = conv(x, w1_ref)
        m1, v1 = batch_stats(acc1)
        y1 = jnp.maximum(
            (acc1 - m1) * (jax.lax.rsqrt(v1 + EPS) * g1_l) + b1_l, 0.0)

        # ---- main_conv: conv -> BN(train) -> main_bn, fused analytically ----
        acc2 = conv(y1, w2_ref)
        m2, v2 = batch_stats(acc2)
        inv2 = jax.lax.rsqrt(v2 + EPS)
        sig = g2a_l * inv2
        var_t = sig * sig * v2                         # batch var after 1st BN
        scale = sig * g2b_l * jax.lax.rsqrt(var_t + EPS)
        y2 = (acc2 - m2) * scale + b2b_l               # b2a cancels exactly

        # ---- residual add + ReLU (single aligned full-tile store) ----
        out_ref[...] = jnp.maximum(y2 + x, 0.0)

    vspec = pl.BlockSpec(memory_space=pltpu.MemorySpace.VMEM)
    out_p = pl.pallas_call(
        kernel,
        out_shape=jax.ShapeDtypeStruct((R, WC), jnp.float32),  # lane-dense slab
        in_specs=[vspec] * 4,
        out_specs=vspec,
        # Toy sizes fit easily; explicit limit keeps headroom obvious per generation.
        compiler_params=pltpu.CompilerParams(vmem_limit_bytes=32 * 1024 * 1024),
    )(x_p, B1, B2, params)
    return out_p.reshape(N, H, W, C)


def reference(x_nhwc, w1, g1, b1, w2, g2a, b2a, g2b, b2b):
    def conv(x, w):
        return jax.lax.conv_general_dilated(
            x, w, (1, 1), 'SAME', dimension_numbers=('NHWC', 'HWIO', 'NHWC'))

    def bn(x, g, b):
        mean = jnp.mean(x, axis=(0, 1, 2), keepdims=True)
        var = jnp.mean(jnp.square(x - mean), axis=(0, 1, 2), keepdims=True)
        return (x - mean) * jax.lax.rsqrt(var + EPS) * g + b

    y = jnp.maximum(bn(conv(x_nhwc, w1), g1, b1), 0.0)
    y = bn(conv(y, w2), g2a, b2a)
    y = bn(y, g2b, b2b)
    return jnp.maximum(y + x_nhwc, 0.0)


if __name__ == "__main__":
    # in_c == out_c is required for the residual add to be valid.
    N, H, W, C = 2, 16, 16, 8   # W*C = 128 lanes
    key = jax.random.PRNGKey(0)
    ks = jax.random.split(key, 9)
    x = jax.random.normal(ks[0], (N, H, W, C), jnp.float32)
    w1 = 0.1 * jax.random.normal(ks[1], (K, K, C, C), jnp.float32)
    w2 = 0.1 * jax.random.normal(ks[2], (K, K, C, C), jnp.float32)
    g1 = 1.0 + 0.1 * jax.random.normal(ks[3], (C,), jnp.float32)
    b1 = 0.1 * jax.random.normal(ks[4], (C,), jnp.float32)
    g2a = 1.0 + 0.1 * jax.random.normal(ks[5], (C,), jnp.float32)
    b2a = 0.1 * jax.random.normal(ks[6], (C,), jnp.float32)
    g2b = 1.0 + 0.1 * jax.random.normal(ks[7], (C,), jnp.float32)
    b2b = 0.1 * jax.random.normal(ks[8], (C,), jnp.float32)

    out = alpr_res_block(x, w1, g1, b1, w2, g2a, b2a, g2b, b2b)
    out = jax.block_until_ready(out)

    ref = reference(x, w1, g1, b1, w2, g2a, b2a, g2b, b2b)
    assert out.shape == ref.shape and out.dtype == ref.dtype
    assert jnp.allclose(out, ref, atol=2e-4, rtol=2e-4), \
        f"max abs err = {jnp.max(jnp.abs(out - ref))}"
    print("KERNEL_OK")
</pallas_src>

<mosaic_0001>
module attributes {stable_mosaic.version = 11 : i64} {
  func.func @kernel(%arg0: memref<32x128xf32, #tpu.memory_space<vmem>>, %arg1: memref<384x128xf32, #tpu.memory_space<vmem>>, %arg2: memref<384x128xf32, #tpu.memory_space<vmem>>, %arg3: memref<8x128xf32, #tpu.memory_space<vmem>>, %arg4: memref<32x128xf32, #tpu.memory_space<vmem>>) attributes {dimension_semantics = [], scalar_prefetch = 0 : i64, scratch_operands = 0 : i64, tpu.core_type = #tpu.core_type<tc>} {
    %c0 = arith.constant 0 : index
    %c0_0 = arith.constant 0 : index
    %0 = vector.load %arg0[%c0, %c0_0] : memref<32x128xf32, #tpu.memory_space<vmem>>, vector<32x128xf32>
    %c0_1 = arith.constant 0 : index
    %c0_2 = arith.constant 0 : index
    %1 = vector.load %arg3[%c0_1, %c0_2] : memref<8x128xf32, #tpu.memory_space<vmem>>, vector<8x128xf32>
    %2 = vector.extract_strided_slice %1 {offsets = [0, 0], sizes = [1, 128], strides = [1, 1]} : vector<8x128xf32> to vector<1x128xf32>
    %3 = vector.extract_strided_slice %1 {offsets = [1, 0], sizes = [1, 128], strides = [1, 1]} : vector<8x128xf32> to vector<1x128xf32>
    %4 = vector.extract_strided_slice %1 {offsets = [2, 0], sizes = [1, 128], strides = [1, 1]} : vector<8x128xf32> to vector<1x128xf32>
    %5 = vector.extract_strided_slice %1 {offsets = [3, 0], sizes = [1, 128], strides = [1, 1]} : vector<8x128xf32> to vector<1x128xf32>
    %6 = vector.extract_strided_slice %1 {offsets = [4, 0], sizes = [1, 128], strides = [1, 1]} : vector<8x128xf32> to vector<1x128xf32>
    %7 = tpu.iota {dimensions = array<i32: 0>} : vector<32x128xi32>
    %c16_i32 = arith.constant 16 : i32
    %c0_i32 = arith.constant 0 : i32
    %8 = arith.cmpi eq, %c16_i32, %c0_i32 : i32
    %c1_i32 = arith.constant 1 : i32
    %9 = arith.select %8, %c1_i32, %c16_i32 : i32
    %10 = vector.broadcast %9 : i32 to vector<32x128xi32>
    %11 = arith.remsi %7, %10 : vector<32x128xi32>
    %c0_i32_3 = arith.constant 0 : i32
    %12 = vector.broadcast %c0_i32_3 : i32 to vector<32x128xi32>
    %13 = arith.cmpi ne, %11, %12 : vector<32x128xi32>
    %c0_i32_4 = arith.constant 0 : i32
    %14 = vector.broadcast %c0_i32_4 : i32 to vector<32x128xi32>
    %15 = arith.cmpi slt, %11, %14 : vector<32x128xi32>
    %c0_i32_5 = arith.constant 0 : i32
    %16 = arith.cmpi slt, %9, %c0_i32_5 : i32
    %17 = vector.broadcast %16 : i1 to vector<32x128xi1>
    %18 = vector.broadcast %17 : vector<32x128xi1> to vector<32x128xi1>
    %19 = arith.xori %15, %18 : vector<32x128xi1>
    %20 = arith.andi %19, %13 : vector<32x128xi1>
    %21 = vector.broadcast %9 : i32 to vector<32x128xi32>
    %22 = arith.addi %11, %21 : vector<32x128xi32>
    %23 = arith.select %20, %22, %11 : vector<32x128xi1>, vector<32x128xi32>
    %c0_i32_6 = arith.constant 0 : i32
    %24 = vector.broadcast %c0_i32_6 : i32 to vector<32x128xi32>
    %25 = arith.cmpi eq, %23, %24 : vector<32x128xi32>
    %c16_i32_7 = arith.constant 16 : i32
    %c0_i32_8 = arith.constant 0 : i32
    %26 = arith.cmpi eq, %c16_i32_7, %c0_i32_8 : i32
    %c1_i32_9 = arith.constant 1 : i32
    %27 = arith.select %26, %c1_i32_9, %c16_i32_7 : i32
    %28 = vector.broadcast %27 : i32 to vector<32x128xi32>
    %29 = arith.remsi %7, %28 : vector<32x128xi32>
    %c0_i32_10 = arith.constant 0 : i32
    %30 = vector.broadcast %c0_i32_10 : i32 to vector<32x128xi32>
    %31 = arith.cmpi ne, %29, %30 : vector<32x128xi32>
    %c0_i32_11 = arith.constant 0 : i32
    %32 = vector.broadcast %c0_i32_11 : i32 to vector<32x128xi32>
    %33 = arith.cmpi slt, %29, %32 : vector<32x128xi32>
    %c0_i32_12 = arith.constant 0 : i32
    %34 = arith.cmpi slt, %27, %c0_i32_12 : i32
    %35 = vector.broadcast %34 : i1 to vector<32x128xi1>
    %36 = vector.broadcast %35 : vector<32x128xi1> to vector<32x128xi1>
    %37 = arith.xori %33, %36 : vector<32x128xi1>
    %38 = arith.andi %37, %31 : vector<32x128xi1>
    %39 = vector.broadcast %27 : i32 to vector<32x128xi32>
    %40 = arith.addi %29, %39 : vector<32x128xi32>
    %41 = arith.select %38, %40, %29 : vector<32x128xi1>, vector<32x128xi32>
    %c15_i32 = arith.constant 15 : i32
    %42 = vector.broadcast %c15_i32 : i32 to vector<32x128xi32>
    %43 = arith.cmpi eq, %41, %42 : vector<32x128xi32>
    %c1_i32_13 = arith.constant 1 : i32
    %44 = tpu.dynamic_rotate %0 by %c1_i32_13 dim 0 : vector<32x128xf32>, i32 -> vector<32x128xf32>
    %cst = arith.constant 0.000000e+00 : f32
    %45 = vector.broadcast %cst : f32 to vector<32x128xf32>
    %46 = arith.select %25, %45, %44 : vector<32x128xi1>, vector<32x128xf32>
    %c31_i32 = arith.constant 31 : i32
    %47 = tpu.dynamic_rotate %0 by %c31_i32 dim 0 : vector<32x128xf32>, i32 -> vector<32x128xf32>
    %cst_14 = arith.constant 0.000000e+00 : f32
    %48 = vector.broadcast %cst_14 : f32 to vector<32x128xf32>
    %49 = arith.select %43, %48, %47 : vector<32x128xi1>, vector<32x128xf32>
    %50 = tpu.concatenate %46, %0, %49 in 1 : vector<32x128xf32>, vector<32x128xf32>, vector<32x128xf32> -> vector<32x384xf32>
    %c0_15 = arith.constant 0 : index
    %c0_16 = arith.constant 0 : index
    %51 = vector.load %arg1[%c0_15, %c0_16] : memref<384x128xf32, #tpu.memory_space<vmem>>, vector<384x128xf32>
    %cst_17 = arith.constant dense<0.000000e+00> : vector<32x128xf32>
    %52 = tpu.matmul %50, %51, %cst_17 {dimension_numbers = #tpu.dot_dimension_numbers<[1], [0], [0], [1], [0, 0, 1, 1], [], []>} : vector<32x384xf32>, vector<384x128xf32>, vector<32x128xf32> -> vector<32x128xf32>
    %cst_18 = arith.constant dense<0.000000e+00> : vector<128xf32>
    %53 = vector.multi_reduction <add>, %52, %cst_18 [0] : vector<32x128xf32> to vector<128xf32>
    %54 = vector.shape_cast %53 : vector<128xf32> to vector<1x128xf32>
    %c8_i32 = arith.constant 8 : i32
    %55 = tpu.dynamic_rotate %54 by %c8_i32 dim 1 : vector<1x128xf32>, i32 -> vector<1x128xf32>
    %56 = arith.addf %54, %55 : vector<1x128xf32>
    %c16_i32_19 = arith.constant 16 : i32
    %57 = tpu.dynamic_rotate %56 by %c16_i32_19 dim 1 : vector<1x128xf32>, i32 -> vector<1x128xf32>
    %58 = arith.addf %56, %57 : vector<1x128xf32>
    %c32_i32 = arith.constant 32 : i32
    %59 = tpu.dynamic_rotate %58 by %c32_i32 dim 1 : vector<1x128xf32>, i32 -> vector<1x128xf32>
    %60 = arith.addf %58, %59 : vector<1x128xf32>
    %c64_i32 = arith.constant 64 : i32
    %61 = tpu.dynamic_rotate %60 by %c64_i32 dim 1 : vector<1x128xf32>, i32 -> vector<1x128xf32>
    %62 = arith.addf %60, %61 : vector<1x128xf32>
    %cst_20 = arith.constant 0.001953125 : f32
    %63 = vector.broadcast %cst_20 : f32 to vector<1x128xf32>
    %64 = arith.mulf %62, %63 : vector<1x128xf32>
    %65 = vector.broadcast %64 : vector<1x128xf32> to vector<32x128xf32>
    %66 = arith.subf %52, %65 : vector<32x128xf32>
    %67 = arith.mulf %66, %66 : vector<32x128xf32>
    %cst_21 = arith.constant dense<0.000000e+00> : vector<128xf32>
    %68 = vector.multi_reduction <add>, %67, %cst_21 [0] : vector<32x128xf32> to vector<128xf32>
    %69 = vector.shape_cast %68 : vector<128xf32> to vector<1x128xf32>
    %c8_i32_22 = arith.constant 8 : i32
    %70 = tpu.dynamic_rotate %69 by %c8_i32_22 dim 1 : vector<1x128xf32>, i32 -> vector<1x128xf32>
    %71 = arith.addf %69, %70 : vector<1x128xf32>
    %c16_i32_23 = arith.constant 16 : i32
    %72 = tpu.dynamic_rotate %71 by %c16_i32_23 dim 1 : vector<1x128xf32>, i32 -> vector<1x128xf32>
    %73 = arith.addf %71, %72 : vector<1x128xf32>
    %c32_i32_24 = arith.constant 32 : i32
    %74 = tpu.dynamic_rotate %73 by %c32_i32_24 dim 1 : vector<1x128xf32>, i32 -> vector<1x128xf32>
    %75 = arith.addf %73, %74 : vector<1x128xf32>
    %c64_i32_25 = arith.constant 64 : i32
    %76 = tpu.dynamic_rotate %75 by %c64_i32_25 dim 1 : vector<1x128xf32>, i32 -> vector<1x128xf32>
    %77 = arith.addf %75, %76 : vector<1x128xf32>
    %cst_26 = arith.constant 0.001953125 : f32
    %78 = vector.broadcast %cst_26 : f32 to vector<1x128xf32>
    %79 = arith.mulf %77, %78 : vector<1x128xf32>
    %80 = vector.broadcast %64 : vector<1x128xf32> to vector<32x128xf32>
    %81 = arith.subf %52, %80 : vector<32x128xf32>
    %cst_27 = arith.constant 9.99999974E-6 : f32
    %82 = vector.broadcast %cst_27 : f32 to vector<1x128xf32>
    %83 = arith.addf %79, %82 : vector<1x128xf32>
    %84 = math.rsqrt %83 : vector<1x128xf32>
    %85 = arith.mulf %84, %2 : vector<1x128xf32>
    %86 = vector.broadcast %85 : vector<1x128xf32> to vector<32x128xf32>
    %87 = arith.mulf %81, %86 : vector<32x128xf32>
    %88 = vector.broadcast %3 : vector<1x128xf32> to vector<32x128xf32>
    %89 = arith.addf %87, %88 : vector<32x128xf32>
    %cst_28 = arith.constant 0.000000e+00 : f32
    %90 = vector.broadcast %cst_28 : f32 to vector<32x128xf32>
    %91 = arith.maximumf %89, %90 : vector<32x128xf32>
    %c1_i32_29 = arith.constant 1 : i32
    %92 = tpu.dynamic_rotate %91 by %c1_i32_29 dim 0 : vector<32x128xf32>, i32 -> vector<32x128xf32>
    %cst_30 = arith.constant 0.000000e+00 : f32
    %93 = vector.broadcast %cst_30 : f32 to vector<32x128xf32>
    %94 = arith.select %25, %93, %92 : vector<32x128xi1>, vector<32x128xf32>
    %c31_i32_31 = arith.constant 31 : i32
    %95 = tpu.dynamic_rotate %91 by %c31_i32_31 dim 0 : vector<32x128xf32>, i32 -> vector<32x128xf32>
    %cst_32 = arith.constant 0.000000e+00 : f32
    %96 = vector.broadcast %cst_32 : f32 to vector<32x128xf32>
    %97 = arith.select %43, %96, %95 : vector<32x128xi1>, vector<32x128xf32>
    %98 = tpu.concatenate %94, %91, %97 in 1 : vector<32x128xf32>, vector<32x128xf32>, vector<32x128xf32> -> vector<32x384xf32>
    %c0_33 = arith.constant 0 : index
    %c0_34 = arith.constant 0 : index
    %99 = vector.load %arg2[%c0_33, %c0_34] : memref<384x128xf32, #tpu.memory_space<vmem>>, vector<384x128xf32>
    %cst_35 = arith.constant dense<0.000000e+00> : vector<32x128xf32>
    %100 = tpu.matmul %98, %99, %cst_35 {dimension_numbers = #tpu.dot_dimension_numbers<[1], [0], [0], [1], [0, 0, 1, 1], [], []>} : vector<32x384xf32>, vector<384x128xf32>, vector<32x128xf32> -> vector<32x128xf32>
    %cst_36 = arith.constant dense<0.000000e+00> : vector<128xf32>
    %101 = vector.multi_reduction <add>, %100, %cst_36 [0] : vector<32x128xf32> to vector<128xf32>
    %102 = vector.shape_cast %101 : vector<128xf32> to vector<1x128xf32>
    %c8_i32_37 = arith.constant 8 : i32
    %103 = tpu.dynamic_rotate %102 by %c8_i32_37 dim 1 : vector<1x128xf32>, i32 -> vector<1x128xf32>
    %104 = arith.addf %102, %103 : vector<1x128xf32>
    %c16_i32_38 = arith.constant 16 : i32
    %105 = tpu.dynamic_rotate %104 by %c16_i32_38 dim 1 : vector<1x128xf32>, i32 -> vector<1x128xf32>
    %106 = arith.addf %104, %105 : vector<1x128xf32>
    %c32_i32_39 = arith.constant 32 : i32
    %107 = tpu.dynamic_rotate %106 by %c32_i32_39 dim 1 : vector<1x128xf32>, i32 -> vector<1x128xf32>
    %108 = arith.addf %106, %107 : vector<1x128xf32>
    %c64_i32_40 = arith.constant 64 : i32
    %109 = tpu.dynamic_rotate %108 by %c64_i32_40 dim 1 : vector<1x128xf32>, i32 -> vector<1x128xf32>
    %110 = arith.addf %108, %109 : vector<1x128xf32>
    %cst_41 = arith.constant 0.001953125 : f32
    %111 = vector.broadcast %cst_41 : f32 to vector<1x128xf32>
    %112 = arith.mulf %110, %111 : vector<1x128xf32>
    %113 = vector.broadcast %112 : vector<1x128xf32> to vector<32x128xf32>
    %114 = arith.subf %100, %113 : vector<32x128xf32>
    %115 = arith.mulf %114, %114 : vector<32x128xf32>
    %cst_42 = arith.constant dense<0.000000e+00> : vector<128xf32>
    %116 = vector.multi_reduction <add>, %115, %cst_42 [0] : vector<32x128xf32> to vector<128xf32>
    %117 = vector.shape_cast %116 : vector<128xf32> to vector<1x128xf32>
    %c8_i32_43 = arith.constant 8 : i32
    %118 = tpu.dynamic_rotate %117 by %c8_i32_43 dim 1 : vector<1x128xf32>, i32 -> vector<1x128xf32>
    %119 = arith.addf %117, %118 : vector<1x128xf32>
    %c16_i32_44 = arith.constant 16 : i32
    %120 = tpu.dynamic_rotate %119 by %c16_i32_44 dim 1 : vector<1x128xf32>, i32 -> vector<1x128xf32>
    %121 = arith.addf %119, %120 : vector<1x128xf32>
    %c32_i32_45 = arith.constant 32 : i32
    %122 = tpu.dynamic_rotate %121 by %c32_i32_45 dim 1 : vector<1x128xf32>, i32 -> vector<1x128xf32>
    %123 = arith.addf %121, %122 : vector<1x128xf32>
    %c64_i32_46 = arith.constant 64 : i32
    %124 = tpu.dynamic_rotate %123 by %c64_i32_46 dim 1 : vector<1x128xf32>, i32 -> vector<1x128xf32>
    %125 = arith.addf %123, %124 : vector<1x128xf32>
    %cst_47 = arith.constant 0.001953125 : f32
    %126 = vector.broadcast %cst_47 : f32 to vector<1x128xf32>
    %127 = arith.mulf %125, %126 : vector<1x128xf32>
    %cst_48 = arith.constant 9.99999974E-6 : f32
    %128 = vector.broadcast %cst_48 : f32 to vector<1x128xf32>
    %129 = arith.addf %127, %128 : vector<1x128xf32>
    %130 = math.rsqrt %129 : vector<1x128xf32>
    %131 = arith.mulf %4, %130 : vector<1x128xf32>
    %132 = arith.mulf %131, %131 : vector<1x128xf32>
    %133 = arith.mulf %132, %127 : vector<1x128xf32>
    %134 = arith.mulf %131, %5 : vector<1x128xf32>
    %cst_49 = arith.constant 9.99999974E-6 : f32
    %135 = vector.broadcast %cst_49 : f32 to vector<1x128xf32>
    %136 = arith.addf %133, %135 : vector<1x128xf32>
    %137 = math.rsqrt %136 : vector<1x128xf32>
    %138 = arith.mulf %134, %137 : vector<1x128xf32>
    %139 = vector.broadcast %112 : vector<1x128xf32> to vector<32x128xf32>
    %140 = arith.subf %100, %139 : vector<32x128xf32>
    %141 = vector.broadcast %138 : vector<1x128xf32> to vector<32x128xf32>
    %142 = arith.mulf %140, %141 : vector<32x128xf32>
    %143 = vector.broadcast %6 : vector<1x128xf32> to vector<32x128xf32>
    %144 = arith.addf %142, %143 : vector<32x128xf32>
    %145 = arith.addf %144, %0 : vector<32x128xf32>
    %cst_50 = arith.constant 0.000000e+00 : f32
    %146 = vector.broadcast %cst_50 : f32 to vector<32x128xf32>
    %147 = arith.maximumf %145, %146 : vector<32x128xf32>
    %c0_51 = arith.constant 0 : index
    %c0_52 = arith.constant 0 : index
    %148 = vector.load %arg4[%c0_51, %c0_52] : memref<32x128xf32, #tpu.memory_space<vmem>>, vector<32x128xf32>
    tpu.vector_store %arg4[%c0_51, %c0_52], %147 {strides = array<i32>} : memref<32x128xf32, #tpu.memory_space<vmem>>, vector<32x128xf32>,
    return
  }
}

</mosaic_0001>

<bundles_post_ra>
// kernel: tpu_custom_call.1
= control target key start
LH: loop header
LB: loop body
LE: loop exit
PB: predicated region body
PF: predicated region fallthrough
CT: control target
= control target key end

     0   :  { %9 = vsyncpa [#allocation3], 0  ;;  %s1137_s0 = inlined_call_operand.hbm [shape: f32[32,128], index: 0, kind: input, shape index: {}]   ;;  %s1138_s1 = inlined_call_operand.hbm [shape: f32[384,128], index: 1, kind: input, shape index: {}]   ;;  %s1139_s2 = inlined_call_operand.hbm [shape: f32[384,128], index: 2, kind: input, shape index: {}]   ;;  %s1140_s3 = inlined_call_operand.hbm [shape: f32[8,128], index: 3, kind: input, shape index: {}]   ;;  %s1141_s4 = inlined_call_operand.hbm [shape: f32[32,128], index: 4, kind: output, shape index: {}]  }
   0x1   :  { %10 = vsyncpa [#allocation6], 0 }
   0x2   :  { %11 = vsyncpa [#allocation9], 0 }
   0x3   :  { %12 = vsyncpa [#allocation4], 0  ;;  %s30_s17 = sshll.u32 %s1138_s1, 4  ;;  %s872_s18 = smov [#allocation5]   ;;  %s31_s17 = int_to_ptr.hbm [resolvable:$true] %s30_s17 }
   0x4   :  { %s32_s19 = sshll.u32 %s872_s18, 4  ;;  %s17_s22 = sshll.u32 %s1137_s0, 4  ;;  %s33_s19 = int_to_ptr.vmem [resolvable:$true] %s32_s19  ;;  %s18_s22 = int_to_ptr.hbm [resolvable:$true] %s17_s22 }
   0x5   :  { %s873_s23 = smov 128   ;;  %s874_s24 = smov 8  }
   0x6   :  { %38 = dma.hbm_to_vmem [thread:$0]  %s31_s17, 6144, %s33_s19, [#allocation6], %s873_s23, %s873_s23, %s874_s24  }
   0x7   :  { %s875_s25 = smov [#allocation2]   ;;  %s43_s1 = sshll.u32 %s1139_s2, 4  ;;  %s44_s1 = int_to_ptr.hbm [resolvable:$true] %s43_s1 }
   0x8   :  { %s19_s26 = sshll.u32 %s875_s25, 4  ;;  %s57_s30 = sshll.u32 %s1140_s3, 4  ;;  %s20_s26 = int_to_ptr.vmem [resolvable:$true] %s19_s26  ;;  %s58_s30 = int_to_ptr.hbm [resolvable:$true] %s57_s30 }
   0x9   :  { %25 = dma.hbm_to_vmem [thread:$0]  %s18_s22, 512, %s20_s26, [#allocation3], %s873_s23, %s873_s23, %s874_s24  }
   0xa   :  { %s876_s5 = smov [#allocation7]   ;;  %s877_s7 = smov [#allocation8]  }
   0xb   :  { %s45_s6 = sshll.u32 %s876_s5, 4  ;;  %s59_s2 = sshll.u32 %s877_s7, 4  ;;  %s46_s6 = int_to_ptr.vmem [resolvable:$true] %s45_s6  ;;  %s60_s2 = int_to_ptr.vmem [resolvable:$true] %s59_s2 }
   0xc   :  { %51 = dma.hbm_to_vmem [thread:$0]  %s44_s1, 6144, %s46_s6, [#allocation6], %s873_s23, %s873_s23, %s874_s24  }
   0xd   :  { %62 = dma.hbm_to_vmem [thread:$0]  %s58_s30, 128, %s60_s2, [#allocation9]  }
   0xe   :  { %864 = dma.done.wait [#allocation3], 512  }
   0xf   :  { %865 = vsyncadd [#allocation3], 4294966784 }
  0x10   :  { %866 = dma.done.wait [#allocation6], 12288  }
  0x11   :  { %867 = vsyncadd [#allocation6], 4294955008 }
  0x12   :  { %868 = dma.done.wait [#allocation9], 128  }
  0x13   :  { %869 = vsyncadd [#allocation9], 4294967168  ;;  %v218_v0 = vld [vmem:[#allocation5 + $0x178] sm:$0xff]  ;;  %v217_v1 = vld [vmem:[#allocation5 + $0x170] sm:$0xff]  ;;  %v84_v32 = vlaneseq  ;;  %s878_s3 = smov 16   ;;  %s879_s8 = smov 32  }
  0x14   :  { %v186_v2 = vld [vmem:[#allocation5 + $0x78] sm:$0xff]  ;;  %277 = vmatpush.msra.mxu2 %v218_v0  ;;  %v185_v4 = vld [vmem:[#allocation5 + $0x70] sm:$0xff]  ;;  %v216_v5 = vld [vmem:[#allocation5 + $0x168] sm:$0xff]  ;;  %s880_s9 = smov 64   ;;  %s881_s10 = smov [#allocation10]  }
  0x15   :  { %219 = vmatpush.msra.mxu0 %v186_v2  ;;  %v202_v3 = vld [vmem:[#allocation5 + $0xf8] sm:$0xff]  ;;  %v201_v6 = vld [vmem:[#allocation5 + $0xf0] sm:$0xff]  ;;  %v184_v7 = vld [vmem:[#allocation5 + $0x68] sm:$0xff]  ;;  %v932_v41 = vshrl.u32 %v84_v32, 7  ;;  %s659_s11 = sshll.u32 %s881_s10, 4  ;;  %s661_s14 = sshll.u32 %s1141_s4, 4  ;;  %s660_s11 = int_to_ptr.vmem [resolvable:$true] %s659_s11  ;;  %s662_s14 = int_to_ptr.hbm [resolvable:$true] %s661_s14 }
  0x16   :  { %248 = vmatpush.msra.mxu1 %v202_v3  ;;  %278 = vmatpush.msra.mxu2 %v217_v1  ;;  %v200_v8 = vld [vmem:[#allocation5 + $0xe8] sm:$0xff]  ;;  %v215_v9 = vld [vmem:[#allocation5 + $0x160] sm:$0xff]  ;;  %v214_v12 = vld [vmem:[#allocation5 + $0x158] sm:$0xff] }
  0x17   :  { %220 = vmatpush.msra.mxu0 %v185_v4  ;;  %v183_v10 = vld [vmem:[#allocation5 + $0x60] sm:$0xff]  ;;  %v182_v13 = vld [vmem:[#allocation5 + $0x58] sm:$0xff]  ;;  %v213_v15 = vld [vmem:[#allocation5 + $0x150] sm:$0xff]  ;;  %vm162_vm0 = vcmp.lt.s32.totalorder %v932_v41, 7  ;;  %v93_v51 = vand.u32 15, %v932_v41  ;;  %vm149_vm1 = vcmp.lt.s32.totalorder %v932_v41, 1 }
  0x18   :  { %249 = vmatpush.msra.mxu1 %v201_v6  ;;  %279 = vmatpush.msra.mxu2 %v216_v5  ;;  %v199_v11 = vld [vmem:[#allocation5 + $0xe0] sm:$0xff]  ;;  %v198_v14 = vld [vmem:[#allocation5 + $0xd8] sm:$0xff]  ;;  %v181_v16 = vld [vmem:[#allocation5 + $0x50] sm:$0xff]  ;;  %v86_v59 = vadd.s32 8, %v932_v41  ;;  %v87_v5 = vadd.s32 16, %v932_v41 }
  0x19   :  { %221 = vmatpush.msra.mxu0 %v184_v7  ;;  %v197_v17 = vld [vmem:[#allocation5 + $0xd0] sm:$0xff]  ;;  %v212_v18 = vld [vmem:[#allocation5 + $0x148] sm:$0xff]  ;;  %v211_v21 = vld [vmem:[#allocation5 + $0x140] sm:$0xff]  ;;  %vm948_vm2 = vcmp.ne.s32.totalorder %v93_v51, 0 }
  0x1a   :  { %250 = vmatpush.msra.mxu1 %v200_v8  ;;  %280 = vmatpush.msra.mxu2 %v215_v9  ;;  %v180_v19 = vld [vmem:[#allocation5 + $0x48] sm:$0xff]  ;;  %v179_v22 = vld [vmem:[#allocation5 + $0x40] sm:$0xff]  ;;  %v210_v24 = vld [vmem:[#allocation5 + $0x138] sm:$0xff]  ;;  %v100_v63 = vand.u32 15, %v86_v59  ;;  %v107_v7 = vand.u32 15, %v87_v5 }
  0x1b   :  { %222 = vmatpush.msra.mxu0 %v183_v10  ;;  %v196_v20 = vld [vmem:[#allocation5 + $0xc8] sm:$0xff]  ;;  %v195_v23 = vld [vmem:[#allocation5 + $0xc0] sm:$0xff]  ;;  %v178_v25 = vld [vmem:[#allocation5 + $0x38] sm:$0xff]  ;;  %v88_v10 = vadd.s32 24, %v932_v41 }
  0x1c   :  { %251 = vmatpush.msra.mxu1 %v199_v11  ;;  %281 = vmatpush.msra.mxu2 %v214_v12  ;;  %v194_v26 = vld [vmem:[#allocation5 + $0xb8] sm:$0xff]  ;;  %v209_v27 = vld [vmem:[#allocation5 + $0x130] sm:$0xff]  ;;  %v208_v30 = vld [vmem:[#allocation5 + $0x128] sm:$0xff]  ;;  %vm961_vm3 = vcmp.ne.s32.totalorder %v100_v63, 15  ;;  %vm978_vm4 = vcmp.ne.s32.totalorder %v107_v7, 0 }
  0x1d   :  { %223 = vmatpush.msra.mxu0 %v182_v13  ;;  %v177_v28 = vld [vmem:[#allocation5 + $0x30] sm:$0xff]  ;;  %v176_v31 = vld [vmem:[#allocation5 + $0x28] sm:$0xff]  ;;  %v207_v34 = vld [vmem:[#allocation5 + $0x120] sm:$0xff]  ;;  %v114_v13 = vand.u32 15, %v88_v10 }
  0x1e   :  { %252 = vmatpush.msra.mxu1 %v198_v14  ;;  %282 = vmatpush.msra.mxu2 %v213_v15  ;;  %v193_v29 = vld [vmem:[#allocation5 + $0xb0] sm:$0xff]  ;;  %v192_v33 = vld [vmem:[#allocation5 + $0xa8] sm:$0xff]  ;;  %v175_v35 = vld [vmem:[#allocation5 + $0x20] sm:$0xff] }
  0x1f   :  { %224 = vmatpush.msra.mxu0 %v181_v16  ;;  %v206_v36 = vld [vmem:[#allocation5 + $0x118] sm:$0xff]  ;;  %v191_v37 = vld [vmem:[#allocation5 + $0xa0] sm:$0xff]  ;;  %v930_v40 = vld [vmem:[#allocation2 + $0x8] sm:$0xff]  ;;  %vm987_vm5 = vcmp.ne.s32.totalorder %v114_v13, 15 }
  0x20   :  { %253 = vmatpush.msra.mxu1 %v197_v17  ;;  %283 = vmatpush.msra.mxu2 %v212_v18  ;;  %v174_v38 = vld [vmem:[#allocation5 + $0x18] sm:$0xff]  ;;  %v928_v39 = vld [vmem:[#allocation2] sm:$0xff]  ;;  %v205_v44 = vld [vmem:[#allocation5 + $0x110] sm:$0xff]  ;;  %v159_v48 = vrot.slane %v930_v40, 1  ;;  %v146_v1 = vrot.slane %v930_v40, 7 }
  0x21   :  { %225 = vmatpush.msra.mxu0 %v180_v19  ;;  %v190_v42 = vld [vmem:[#allocation5 + $0x98] sm:$0xff]  ;;  %v173_v45 = vld [vmem:[#allocation5 + $0x10] sm:$0xff]  ;;  %v158_v47 = vrot.slane %v928_v39, 1  ;;  %v204_v49 = vld [vmem:[#allocation5 + $0x108] sm:$0xff]  ;;  %v145_v52 = vrot.slane %v928_v39, 7 }
  0x22   :  { %254 = vmatpush.msra.mxu1 %v196_v20  ;;  %284 = vmatpush.msra.mxu2 %v211_v21  ;;  %v934_v43 = vld [vmem:[#allocation2 + $0x18] sm:$0xff]  ;;  %v189_v46 = vld [vmem:[#allocation5 + $0x90] sm:$0xff]  ;;  %v172_v50 = vld [vmem:[#allocation5 + $0x8] sm:$0xff] }
  0x23   :  { %226 = vmatpush.msra.mxu0 %v179_v22  ;;  %v148_v53 = vrot.slane %v934_v43, 7  ;;  %v188_v54 = vld [vmem:[#allocation5 + $0x88] sm:$0xff]  ;;  %v203_v55 = vld [vmem:[#allocation5 + $0x100] sm:$0xff]  ;;  %v165_v57 = vsel %vm162_vm0, %v158_v47, %v159_v48  ;;  %v952_v62 = vld [vmem:[#allocation2 + $0x10] sm:$0xff]  ;;  %v152_v4 = vsel %vm149_vm1, %v145_v52, %v146_v1  ;;  %v161_v6 = vrot.slane %v934_v43, 1 }
  0x24   :  { %255 = vmatpush.msra.mxu1 %v195_v23  ;;  %285 = vmatpush.msra.mxu2 %v210_v24  ;;  %v171_v56 = vld [vmem:[#allocation5] sm:$0xff]  ;;  %v160_v0 = vrot.slane %v952_v62, 1  ;;  %v147_v8 = vrot.slane %v952_v62, 7 }
  0x25   :  { %227 = vmatpush.msra.mxu0 %v178_v25  ;;  %v187_v58 = vld [vmem:[#allocation5 + $0x80] sm:$0xff]  ;;  %v153_v60 = vsel %vm149_vm1, %v148_v53, %v145_v52  ;;  %v166_v14 = vsel %vm162_vm0, %v161_v6, %v158_v47 }
  0x26   :  { %256 = vmatpush.msra.mxu1 %v194_v26  ;;  %286 = vmatpush.msra.mxu2 %v209_v27  ;;  %v164_v2 = vsel %vm162_vm0, %v159_v48, %v160_v0  ;;  %v163_v9 = vsel %vm162_vm0, %v160_v0, %v161_v6  ;;  %v151_v11 = vsel %vm149_vm1, %v146_v1, %v147_v8 }
  0x27   :  { %228 = vmatpush.msra.mxu0 %v177_v28  ;;  %v150_v16 = vsel %vm149_vm1, %v147_v8, %v148_v53 }
  0x28   :  { %257 = vmatpush.msra.mxu1 %v193_v29  ;;  %287 = vmatpush.msra.mxu2 %v208_v30 }
  0x29   :  { %229 = vmatpush.msra.mxu0 %v176_v31 }
  0x2a   :  { %258 = vmatpush.msra.mxu1 %v192_v33  ;;  %288 = vmatpush.msra.mxu2 %v207_v34 }
  0x2b   :  { %230 = vmatpush.msra.mxu0 %v175_v35 }
  0x2c   :  { %259 = vmatpush.msra.mxu1 %v191_v37  ;;  %289 = vmatpush.msra.mxu2 %v206_v36 }
  0x2d   :  { %231 = vmatpush.msra.mxu0 %v174_v38 }
  0x2e   :  { %260 = vmatpush.msra.mxu1 %v190_v42  ;;  %290 = vmatpush.msra.mxu2 %v205_v44 }
  0x2f   :  { %232 = vmatpush.msra.mxu0 %v173_v45 }
  0x30   :  { %261 = vmatpush.msra.mxu1 %v189_v46  ;;  %291 = vmatpush.msra.mxu2 %v204_v49 }
  0x31   :  { %233 = vmatpush.msra.mxu0 %v172_v50 }
  0x32   :  { %262 = vmatpush.msra.mxu1 %v188_v54  ;;  %292 = vmatpush.msra.mxu2 %v203_v55 }
  0x33   :  { %234 = vmatpush.msra.mxu0 %v171_v56  ;;  %293 = vmatmul.f32.vlgmr.msra.gmra.mxu2 %v165_v57 }
  0x34   :  { %263 = vmatpush.msra.mxu1 %v187_v58  ;;  %677 = vmatmul.msk.f32.vlgmr.msra.gmra.mxu0 %vm948_vm2, %v153_v60 }
  0x35   :  { %264 = vmatmul.f32.vlgmr.msra.gmra.mxu1 %v928_v39 }
  0x3b   :  { %681 = vmatmul.msk.f32.gmra.mxu2 %vm961_vm3, %v164_v2 }
  0x3c   :  { %238 = vmatmul.f32.gmra.mxu0 %v152_v4 }
  0x3d   :  { %267 = vmatmul.f32.gmra.mxu1 %v930_v40 }
  0x43   :  { %299 = vmatmul.f32.gmra.mxu2 %v163_v9 }
  0x44   :  { %679 = vmatmul.msk.f32.gmra.mxu0 %vm978_vm4, %v151_v11 }
  0x45   :  { %270 = vmatmul.f32.gmra.mxu1 %v952_v62 }
  0x4b   :  { %683 = vmatmul.msk.f32.gmra.mxu2 %vm987_vm5, %v166_v14 }
  0x4c   :  { %244 = vmatmul.f32.gmra.mxu0 %v150_v16 }
  0x4d   :  { %273 = vmatmul.f32.gmra.mxu1 %v934_v43 }
  0xb1   :  { %v236_v17 = vpop.f32.mrf.mxu0 }
  0xb2   :  { %v265_v18 = vpop.f32.mrf.mxu1 }
  0xb3   :  { %v266_v27 = vadd.f32 %v265_v18, %v236_v17 }
  0xb6   :  { %v294_v19 = vpop.f32.mrf.mxu2 }
  0xb7   :  { %v295_v32 = vadd.f32 %v294_v19, %v266_v27  ;;  %v1023_v27 = vld [vmem:[#allocation7 + $0x178] sm:$0xff] }
  0xb8   :  { %515 = vmatpush.msrb.mxu1 %v1023_v27 }
  0xb9   :  { %v239_v20 = vpop.f32.mrf.mxu0 }
  0xba   :  { %v268_v21 = vpop.f32.mrf.mxu1 }
  0xbb   :  { %v269_v25 = vadd.f32 %v268_v21, %v239_v20 }
  0xbe   :  { %v297_v22 = vpop.f32.mrf.mxu2 }
  0xbf   :  { %v298_v29 = vadd.f32 %v297_v22, %v269_v25  ;;  %v439_v25 = vld [vmem:[#allocation7 + $0xf0] sm:$0xff] }
  0xc1   :  { %v242_v23 = vpop.f32.mrf.mxu0  ;;  %v306_v35 = vadd.f32 %v298_v29, %v295_v32 }
  0xc2   :  { %v271_v24 = vpop.f32.mrf.mxu1 }
  0xc3   :  { %v272_v28 = vadd.f32 %v271_v24, %v242_v23  ;;  %v440_v24 = vld [vmem:[#allocation7 + $0xf8] sm:$0xff] }
  0xc4   :  { %486 = vmatpush.msrb.mxu0 %v440_v24  ;;  %696 = vmatpush.msrb.mxu2 %v440_v24  ;;  %v441_v24 = vld [vmem:[#allocation7 + $0x100] sm:$0xff] }
  0xc6   :  { %v300_v26 = vpop.f32.mrf.mxu2  ;;  %487 = vmatpush.msrb.mxu0 %v439_v25  ;;  %697 = vmatpush.msrb.mxu2 %v439_v25 }
  0xc7   :  { %v301_v33 = vadd.f32 %v300_v26, %v272_v28  ;;  %v424_v26 = vld [vmem:[#allocation7 + $0x78] sm:$0xff]  ;;  %v438_v28 = vld [vmem:[#allocation7 + $0xe8] sm:$0xff] }
  0xc8   :  { %457 = vmatpush.msra.mxu3 %v424_v26  ;;  %488 = vmatpush.msrb.mxu0 %v438_v28 }
  0xc9   :  { %v245_v30 = vpop.f32.mrf.mxu0  ;;  %v307_v37 = vadd.f32 %v306_v35, %v301_v33  ;;  %698 = vmatpush.msrb.mxu2 %v438_v28  ;;  %v421_v35 = vld [vmem:[#allocation7 + $0x60] sm:$0xff] }
  0xca   :  { %v274_v31 = vpop.f32.mrf.mxu1 }
  0xcb   :  { %v275_v34 = vadd.f32 %v274_v31, %v245_v30  ;;  %v1026_v30 = vld [vmem:[#allocation7 + $0x170] sm:$0xff]  ;;  %v437_v31 = vld [vmem:[#allocation7 + $0xe0] sm:$0xff] }
  0xcc   :  { %516 = vmatpush.msrb.mxu1 %v1026_v30  ;;  %489 = vmatpush.msrb.mxu0 %v437_v31 }
  0xcd   :  { %699 = vmatpush.msrb.mxu2 %v437_v31 }
  0xce   :  { %v303_v36 = vpop.f32.mrf.mxu2 }
  0xcf   :  { %v304_v38 = vadd.f32 %v303_v36, %v275_v34  ;;  %v436_v34 = vld [vmem:[#allocation7 + $0xd8] sm:$0xff]  ;;  %v1032_v36 = vld [vmem:[#allocation7 + $0x160] sm:$0xff] }
  0xd0   :  { %490 = vmatpush.msrb.mxu0 %v436_v34  ;;  %700 = vmatpush.msrb.mxu2 %v436_v34 }
  0xd1   :  { %v308_v42 = vadd.f32 %v307_v37, %v304_v38  ;;  %v435_v37 = vld [vmem:[#allocation7 + $0xd0] sm:$0xff] }
  0xd2   :  { %491 = vmatpush.msrb.mxu0 %v435_v37  ;;  %701 = vmatpush.msrb.mxu2 %v435_v37 }
  0xd3   :  { %v309_v44 = vrot.slane %v308_v42, 4 }
  0xd5   :  { %v310_v45 = vadd.f32 %v309_v44, %v308_v42  ;;  %v1035_v42 = vld [vmem:[#allocation7 + $0x158] sm:$0xff]  ;;  %v434_v44 = vld [vmem:[#allocation7 + $0xc8] sm:$0xff] }
  0xd6   :  { %492 = vmatpush.msrb.mxu0 %v434_v44  ;;  %702 = vmatpush.msrb.mxu2 %v434_v44 }
  0xd7   :  { %v311_v46 = vrot.slane %v310_v45, 2 }
  0xd9   :  { %v312_v47 = vadd.f32 %v311_v46, %v310_v45  ;;  %v419_v45 = vld [vmem:[#allocation7 + $0x50] sm:$0xff] }
  0xda   :  { %v1038_v46 = vld [vmem:[#allocation7 + $0x150] sm:$0xff] }
  0xdb   :  { %v313_v48 = vrot.slane %v312_v47, 1 }
  0xdd   :  { %v314_v49 = vadd.f32 %v313_v48, %v312_v47  ;;  %v433_v47 = vld [vmem:[#allocation7 + $0xc0] sm:$0xff]  ;;  %v418_v48 = vld [vmem:[#allocation7 + $0x48] sm:$0xff] }
  0xde   :  { %493 = vmatpush.msrb.mxu0 %v433_v47  ;;  %703 = vmatpush.msrb.mxu2 %v433_v47 }
  0xdf   :  { %315 = vrot.lane.b32.xlu0 %v314_v49, %s874_s24 }
 0x151   :  { %v316_v50 = vpop.permute.xlu0 %315 }
 0x152   :  { %v317_v51 = vadd.f32 %v316_v50, %v314_v49  ;;  %v1041_v49 = vld [vmem:[#allocation7 + $0x148] sm:$0xff]  ;;  %v432_v50 = vld [vmem:[#allocation7 + $0xb8] sm:$0xff] }
 0x153   :  { %494 = vmatpush.msrb.mxu0 %v432_v50  ;;  %704 = vmatpush.msrb.mxu2 %v432_v50 }
 0x154   :  { %318 = vrot.lane.b32.xlu0 %v317_v51, %s878_s3 }
 0x1c6   :  { %v319_v52 = vpop.permute.xlu0 %318 }
 0x1c7   :  { %v320_v53 = vadd.f32 %v319_v52, %v317_v51  ;;  %v417_v51 = vld [vmem:[#allocation7 + $0x40] sm:$0xff] }
 0x1c8   :  { %v1044_v52 = vld [vmem:[#allocation7 + $0x140] sm:$0xff] }
 0x1c9   :  { %321 = vrot.lane.b32.xlu1 %v320_v53, %s879_s8 }
 0x23b   :  { %v322_v54 = vpop.permute.xlu1 %321 }
 0x23c   :  { %v323_v55 = vadd.f32 %v322_v54, %v320_v53  ;;  %v431_v53 = vld [vmem:[#allocation7 + $0xb0] sm:$0xff]  ;;  %v416_v54 = vld [vmem:[#allocation7 + $0x38] sm:$0xff] }
 0x23d   :  { %495 = vmatpush.msrb.mxu0 %v431_v53  ;;  %705 = vmatpush.msrb.mxu2 %v431_v53 }
 0x23e   :  { %324 = vrot.lane.b32.xlu1 %v323_v55, %s880_s9 }
 0x2b0   :  { %v325_v56 = vpop.permute.xlu1 %324 }
 0x2b1   :  { %v326_v57 = vadd.f32 %v325_v56, %v323_v55  ;;  %v1047_v55 = vld [vmem:[#allocation7 + $0x138] sm:$0xff]  ;;  %v430_v56 = vld [vmem:[#allocation7 + $0xa8] sm:$0xff] }
 0x2b2   :  { %496 = vmatpush.msrb.mxu0 %v430_v56  ;;  %706 = vmatpush.msrb.mxu2 %v430_v56 }
 0x2b3   :  { %v327_v58 = vmul.f32 0.001953125, %v326_v57  ;;  %v415_v57 = vld [vmem:[#allocation7 + $0x30] sm:$0xff] }
 0x2b5   :  { %v328_v59 = vperm.slane %v327_v58, 0  ;;  %v1050_v58 = vld [vmem:[#allocation7 + $0x130] sm:$0xff] }
 0x2b7   :  { %v1000_v60 = vsub.f32 %v295_v32, %v328_v59  ;;  %v1002_v63 = vsub.f32 %v298_v29, %v328_v59  ;;  %v1004_v0 = vsub.f32 %v301_v33, %v328_v59  ;;  %v1006_v1 = vsub.f32 %v304_v38, %v328_v59  ;;  %v423_v29 = vld [vmem:[#allocation7 + $0x70] sm:$0xff]  ;;  %v422_v32 = vld [vmem:[#allocation7 + $0x68] sm:$0xff]  ;;  %v420_v38 = vld [vmem:[#allocation7 + $0x58] sm:$0xff] }
 0x2b8   :  { %458 = vmatpush.msra.mxu3 %v423_v29  ;;  %v1029_v33 = vld [vmem:[#allocation7 + $0x168] sm:$0xff]  ;;  %v429_v59 = vld [vmem:[#allocation7 + $0xa0] sm:$0xff] }
 0x2b9   :  { %v333_v2 = vmul.f32 %v1000_v60, %v1000_v60  ;;  %v334_v4 = vmul.f32 %v1002_v63, %v1002_v63  ;;  %v335_v5 = vmul.f32 %v1004_v0, %v1004_v0  ;;  %v336_v7 = vmul.f32 %v1006_v1, %v1006_v1  ;;  %517 = vmatpush.msrb.mxu1 %v1029_v33 }
 0x2ba   :  { %459 = vmatpush.msra.mxu3 %v422_v32  ;;  %497 = vmatpush.msrb.mxu0 %v429_v59 }
 0x2bb   :  { %v337_v6 = vadd.f32 %v334_v4, %v333_v2  ;;  %518 = vmatpush.msrb.mxu1 %v1032_v36  ;;  %707 = vmatpush.msrb.mxu2 %v429_v59  ;;  %v414_v2 = vld [vmem:[#allocation7 + $0x28] sm:$0xff] }
 0x2bc   :  { %460 = vmatpush.msra.mxu3 %v421_v35  ;;  %v446_v4 = vld [vmem:[#allocation7 + $0x128] sm:$0xff] }
 0x2bd   :  { %v338_v8 = vadd.f32 %v337_v6, %v335_v5  ;;  %519 = vmatpush.msrb.mxu1 %v1035_v42  ;;  %v428_v5 = vld [vmem:[#allocation7 + $0x98] sm:$0xff]  ;;  %v413_v6 = vld [vmem:[#allocation7 + $0x20] sm:$0xff] }
 0x2be   :  { %461 = vmatpush.msra.mxu3 %v420_v38  ;;  %498 = vmatpush.msrb.mxu0 %v428_v5 }
 0x2bf   :  { %v339_v9 = vadd.f32 %v338_v8, %v336_v7  ;;  %520 = vmatpush.msrb.mxu1 %v1038_v46  ;;  %v445_v7 = vld [vmem:[#allocation7 + $0x120] sm:$0xff]  ;;  %708 = vmatpush.msrb.mxu2 %v428_v5  ;;  %v427_v8 = vld [vmem:[#allocation7 + $0x90] sm:$0xff] }
 0x2c0   :  { %462 = vmatpush.msra.mxu3 %v419_v45  ;;  %499 = vmatpush.msrb.mxu0 %v427_v8 }
 0x2c1   :  { %v340_v10 = vrot.slane %v339_v9, 4  ;;  %521 = vmatpush.msrb.mxu1 %v1041_v49  ;;  %709 = vmatpush.msrb.mxu2 %v427_v8 }
 0x2c2   :  { %463 = vmatpush.msra.mxu3 %v418_v48 }
 0x2c3   :  { %v341_v11 = vadd.f32 %v340_v10, %v339_v9  ;;  %522 = vmatpush.msrb.mxu1 %v1044_v52  ;;  %v412_v9 = vld [vmem:[#allocation7 + $0x18] sm:$0xff] }
 0x2c4   :  { %464 = vmatpush.msra.mxu3 %v417_v51  ;;  %v444_v10 = vld [vmem:[#allocation7 + $0x118] sm:$0xff] }
 0x2c5   :  { %v342_v13 = vrot.slane %v341_v11, 2  ;;  %523 = vmatpush.msrb.mxu1 %v1047_v55 }
 0x2c6   :  { %465 = vmatpush.msra.mxu3 %v416_v54 }
 0x2c7   :  { %v343_v14 = vadd.f32 %v342_v13, %v341_v11  ;;  %524 = vmatpush.msrb.mxu1 %v1050_v58  ;;  %v426_v11 = vld [vmem:[#allocation7 + $0x88] sm:$0xff]  ;;  %v411_v13 = vld [vmem:[#allocation7 + $0x10] sm:$0xff] }
 0x2c8   :  { %466 = vmatpush.msra.mxu3 %v415_v57  ;;  %500 = vmatpush.msrb.mxu0 %v426_v11 }
 0x2c9   :  { %v344_v16 = vrot.slane %v343_v14, 1  ;;  %525 = vmatpush.msrb.mxu1 %v446_v4  ;;  %710 = vmatpush.msrb.mxu2 %v426_v11 }
 0x2ca   :  { %467 = vmatpush.msra.mxu3 %v414_v2 }
 0x2cb   :  { %v345_v17 = vadd.f32 %v344_v16, %v343_v14  ;;  %526 = vmatpush.msrb.mxu1 %v445_v7  ;;  %v443_v14 = vld [vmem:[#allocation7 + $0x110] sm:$0xff]  ;;  %v425_v16 = vld [vmem:[#allocation7 + $0x80] sm:$0xff] }
 0x2cc   :  { %468 = vmatpush.msra.mxu3 %v413_v6  ;;  %501 = vmatpush.msrb.mxu0 %v425_v16 }
 0x2cd   :  { %346 = vrot.lane.b32.xlu2 %v345_v17, %s874_s24  ;;  %527 = vmatpush.msrb.mxu1 %v444_v10 }
 0x2ce   :  { %469 = vmatpush.msra.mxu3 %v412_v9  ;;  %711 = vmatpush.msrb.mxu2 %v425_v16 }
 0x2cf   :  { %528 = vmatpush.msrb.mxu1 %v443_v14 }
 0x2d0   :  { %470 = vmatpush.msra.mxu3 %v411_v13 }
 0x327   :  { %v347_v18 = vpop.permute.xlu2 %346 }
 0x328   :  { %v348_v19 = vadd.f32 %v347_v18, %v345_v17  ;;  %v410_v18 = vld [vmem:[#allocation7 + $0x8] sm:$0xff] }
 0x329   :  { %471 = vmatpush.msra.mxu3 %v410_v18 }
 0x32a   :  { %349 = vrot.lane.b32.xlu2 %v348_v19, %s878_s3 }
 0x384   :  { %v350_v20 = vpop.permute.xlu2 %349 }
 0x385   :  { %v351_v21 = vadd.f32 %v350_v20, %v348_v19  ;;  %v442_v20 = vld [vmem:[#allocation7 + $0x108] sm:$0xff] }
 0x386   :  { %529 = vmatpush.msrb.mxu1 %v442_v20 }
 0x387   :  { %352 = vrot.lane.b32.xlu0 %v351_v21, %s879_s8 }
 0x388   :  { %530 = vmatpush.msrb.mxu1 %v441_v24 }
 0x3f9   :  { %v353_v22 = vpop.permute.xlu0 %352 }
 0x3fa   :  { %v1019_v23 = vadd.f32 %v353_v22, %v351_v21  ;;  %v409_v22 = vld [vmem:[#allocation7] sm:$0xff] }
 0x3fb   :  { %472 = vmatpush.msra.mxu3 %v409_v22 }
 0x3fc   :  { %355 = vrot.lane.b32.xlu1 %v1019_v23, %s880_s9 }
 0x3fd   :  { %712 = vmatpush.msrb.mxu3 %v1023_v27  ;;  %v1062_v27 = vld [vmem:[#allocation8] sm:$0xff] }
 0x3fe   :  { %v376_v35 = vperm.slane %v1062_v27, 1 }
 0x3ff   :  { %713 = vmatpush.msrb.mxu3 %v1026_v30 }
 0x401   :  { %714 = vmatpush.msrb.mxu3 %v1029_v33 }
 0x403   :  { %715 = vmatpush.msrb.mxu3 %v1032_v36 }
 0x405   :  { %716 = vmatpush.msrb.mxu3 %v1035_v42 }
 0x407   :  { %717 = vmatpush.msrb.mxu3 %v1038_v46 }
 0x409   :  { %718 = vmatpush.msrb.mxu3 %v1041_v49 }
 0x40b   :  { %719 = vmatpush.msrb.mxu3 %v1044_v52 }
 0x40d   :  { %720 = vmatpush.msrb.mxu3 %v1047_v55 }
 0x40f   :  { %721 = vmatpush.msrb.mxu3 %v1050_v58 }
 0x411   :  { %722 = vmatpush.msrb.mxu3 %v446_v4 }
 0x413   :  { %723 = vmatpush.msrb.mxu3 %v445_v7 }
 0x415   :  { %724 = vmatpush.msrb.mxu3 %v444_v10 }
 0x417   :  { %725 = vmatpush.msrb.mxu3 %v443_v14 }
 0x419   :  { %726 = vmatpush.msrb.mxu3 %v442_v20 }
 0x41b   :  { %727 = vmatpush.msrb.mxu3 %v441_v24 }
 0x46e   :  { %v356_v17 = vpop.permute.xlu1 %355 }
 0x46f   :  { %v357_v19 = vadd.f32 %v356_v17, %v1019_v23 }
 0x471   :  { %v358_v21 = vmul.f32 0.001953125, %v357_v19 }
 0x473   :  { %v359_v25 = vadd.f32 1e-05, %v358_v21 }
 0x475   :  { %738 = vrsqrt.f32 %v359_v25  ;;  %vm366_vm7 = vweird.f32 %v359_v25 }
 0x47b   :  { %v739_v23 = vpop.eup %738 }
 0x47c   :  { %v361_v26 = vmul.f32 %v739_v23, %v359_v25  ;;  %vm367_vm6 = vweird.f32 %v739_v23 }
 0x47d   :  { %vm368_vm8 = vmor %vm366_vm7, %vm367_vm6 }
 0x47e   :  { %v362_v28 = vmul.f32 %v739_v23, %v361_v26 }
 0x480   :  { %v363_v29 = vmul.f32 0.5, %v362_v28 }
 0x482   :  { %v364_v31 = vsub.f32 1.5, %v363_v29 }
 0x484   :  { %v365_v30 = vmul.f32 %v739_v23, %v364_v31 }
 0x486   :  { %v369_v32 = vsel %vm368_vm8, %v739_v23, %v365_v30 }
 0x487   :  { %v370_v33 = vmul.f32 %v369_v32, %v1062_v27 }
 0x489   :  { %v371_v34 = vperm.slane %v370_v33, 0 }
 0x48b   :  { %v372_v36 = vmul.f32 %v371_v34, %v1000_v60  ;;  %v374_v37 = vmul.f32 %v371_v34, %v1004_v0  ;;  %v375_v38 = vmul.f32 %v371_v34, %v1006_v1  ;;  %v373_v42 = vmul.f32 %v371_v34, %v1002_v63 }
 0x48d   :  { %v377_v44 = vadd.f32 %v376_v35, %v372_v36  ;;  %v379_v45 = vadd.f32 %v376_v35, %v374_v37  ;;  %v380_v46 = vadd.f32 %v376_v35, %v375_v38  ;;  %v378_v47 = vadd.f32 %v376_v35, %v373_v42 }
 0x48f   :  { %v381_v48 = vmax.f32 %v377_v44, 0.0  ;;  %v383_v49 = vmax.f32 %v379_v45, 0.0  ;;  %v384_v50 = vmax.f32 %v380_v46, 0.0  ;;  %v382_v51 = vmax.f32 %v378_v47, 0.0 }
 0x491   :  { %502 = vmatmul.f32.vlgmr.msrb.gmra.mxu0 %v381_v48  ;;  %508 = vmatmul.f32.vlgmr.msrb.gmra.mxu2 %v383_v49  ;;  %v385_v60 = vrot.slane %v381_v48, 7  ;;  %v388_v52 = vrot.slane %v384_v50, 7  ;;  %v397_v0 = vrot.slane %v381_v48, 1  ;;  %v398_v53 = vrot.slane %v382_v51, 1 }
 0x492   :  { %v386_v54 = vrot.slane %v382_v51, 7  ;;  %v399_v55 = vrot.slane %v383_v49, 1  ;;  %v387_v58 = vrot.slane %v383_v49, 7  ;;  %v400_v2 = vrot.slane %v384_v50, 1 }
 0x493   :  { %v392_v63 = vsel %vm149_vm1, %v388_v52, %v385_v60  ;;  %v403_v1 = vsel %vm162_vm0, %v397_v0, %v398_v53 }
 0x494   :  { %685 = vmatmul.msk.f32.vlgmr.msra.gmra.mxu3 %vm948_vm2, %v392_v63  ;;  %531 = vmatmul.f32.vlgmr.msrb.gmra.mxu1 %v403_v1  ;;  %v391_v56 = vsel %vm149_vm1, %v385_v60, %v386_v54  ;;  %v402_v57 = vsel %vm162_vm0, %v398_v53, %v399_v55  ;;  %v390_v61 = vsel %vm149_vm1, %v386_v54, %v387_v58 }
 0x495   :  { %v389_v59 = vsel %vm149_vm1, %v387_v58, %v388_v52  ;;  %v401_v4 = vsel %vm162_vm0, %v399_v55, %v400_v2  ;;  %v404_v3 = vsel %vm162_vm0, %v400_v2, %v397_v0 }
 0x499   :  { %505 = vmatmul.f32.gmra.mxu0 %v382_v51  ;;  %511 = vmatmul.f32.gmra.mxu2 %v384_v50 }
 0x49c   :  { %476 = vmatmul.f32.gmra.mxu3 %v391_v56  ;;  %689 = vmatmul.msk.f32.gmra.mxu1 %vm961_vm3, %v402_v57 }
 0x4a4   :  { %687 = vmatmul.msk.f32.gmra.mxu3 %vm978_vm4, %v390_v61 }
 0x4ac   :  { %482 = vmatmul.f32.gmra.mxu3 %v389_v59 }
 0x4b4   :  { %537 = vmatmul.f32.vlgmr.msrb.gmra.mxu3 %v401_v4 }
 0x4bc   :  { %691 = vmatmul.msk.f32.gmra.mxu3 %vm987_vm5, %v404_v3 }
 0x50e   :  { %v503_v12 = vpop.f32.mrf.mxu0 }
 0x511   :  { %v532_v8 = vpop.f32.mrf.mxu1 }
 0x514   :  { %v509_v10 = vpop.f32.mrf.mxu2 }
 0x516   :  { %v506_v11 = vpop.f32.mrf.mxu0 }
 0x517   :  { %v474_v5 = vpop.f32.mrf.mxu3 }
 0x518   :  { %v504_v16 = vadd.f32 %v503_v12, %v474_v5 }
 0x519   :  { %v535_v17 = vpop.f32.mrf.mxu1 }
 0x51a   :  { %v533_v20 = vadd.f32 %v532_v8, %v504_v16 }
 0x51c   :  { %v512_v21 = vpop.f32.mrf.mxu2 }
 0x51f   :  { %v477_v6 = vpop.f32.mrf.mxu3 }
 0x520   :  { %v507_v13 = vadd.f32 %v506_v11, %v477_v6 }
 0x522   :  { %v536_v18 = vadd.f32 %v535_v17, %v507_v13 }
 0x524   :  { %v544_v15 = vadd.f32 %v536_v18, %v533_v20 }
 0x527   :  { %v480_v7 = vpop.f32.mrf.mxu3 }
 0x528   :  { %v510_v19 = vadd.f32 %v509_v10, %v480_v7 }
 0x52f   :  { %v483_v9 = vpop.f32.mrf.mxu3 }
 0x530   :  { %v513_v22 = vadd.f32 %v512_v21, %v483_v9 }
 0x537   :  { %v538_v14 = vpop.f32.mrf.mxu3 }
 0x538   :  { %v539_v41 = vadd.f32 %v538_v14, %v510_v19 }
 0x53a   :  { %v545_v25 = vadd.f32 %v544_v15, %v539_v41 }
 0x53f   :  { %v541_v24 = vpop.f32.mrf.mxu3 }
 0x540   :  { %v542_v23 = vadd.f32 %v541_v24, %v513_v22 }
 0x542   :  { %v546_v26 = vadd.f32 %v545_v25, %v542_v23 }
 0x544   :  { %v547_v28 = vrot.slane %v546_v26, 4 }
 0x546   :  { %v548_v29 = vadd.f32 %v547_v28, %v546_v26 }
 0x548   :  { %v549_v31 = vrot.slane %v548_v29, 2 }
 0x54a   :  { %v550_v30 = vadd.f32 %v549_v31, %v548_v29  ;;  %v618_v29 = vrot.slane %v1062_v27, 1 }
 0x54c   :  { %v551_v32 = vrot.slane %v550_v30, 1 }
 0x54e   :  { %v552_v33 = vadd.f32 %v551_v32, %v550_v30 }
 0x550   :  { %553 = vrot.lane.b32.xlu2 %v552_v33, %s874_s24 }
 0x5aa   :  { %v554_v34 = vpop.permute.xlu2 %553 }
 0x5ab   :  { %v555_v35 = vadd.f32 %v554_v34, %v552_v33 }
 0x5ad   :  { %556 = vrot.lane.b32.xlu0 %v555_v35, %s878_s3 }
 0x61f   :  { %v557_v36 = vpop.permute.xlu0 %556 }
 0x620   :  { %v558_v37 = vadd.f32 %v557_v36, %v555_v35  ;;  %v638_v35 = vperm.slane %v1062_v27, 4 }
 0x622   :  { %559 = vrot.lane.b32.xlu1 %v558_v37, %s879_s8 }
 0x694   :  { %v560_v38 = vpop.permute.xlu1 %559 }
 0x695   :  { %v561_v42 = vadd.f32 %v560_v38, %v558_v37 }
 0x697   :  { %562 = vrot.lane.b32.xlu2 %v561_v42, %s880_s9 }
 0x6f1   :  { %v563_v44 = vpop.permute.xlu2 %562 }
 0x6f2   :  { %v564_v45 = vadd.f32 %v563_v44, %v561_v42 }
 0x6f4   :  { %v565_v46 = vmul.f32 0.001953125, %v564_v45 }
 0x6f6   :  { %v566_v47 = vperm.slane %v565_v46, 0 }
 0x6f8   :  { %v1100_v48 = vsub.f32 %v533_v20, %v566_v47  ;;  %v1102_v49 = vsub.f32 %v536_v18, %v566_v47  ;;  %v1104_v50 = vsub.f32 %v539_v41, %v566_v47  ;;  %v1106_v51 = vsub.f32 %v542_v23, %v566_v47 }
 0x6fa   :  { %v571_v60 = vmul.f32 %v1100_v48, %v1100_v48  ;;  %v572_v52 = vmul.f32 %v1102_v49, %v1102_v49  ;;  %v573_v0 = vmul.f32 %v1104_v50, %v1104_v50  ;;  %v574_v63 = vmul.f32 %v1106_v51, %v1106_v51 }
 0x6fc   :  { %v575_v53 = vadd.f32 %v572_v52, %v571_v60 }
 0x6fe   :  { %v576_v1 = vadd.f32 %v575_v53, %v573_v0 }
 0x700   :  { %v577_v54 = vadd.f32 %v576_v1, %v574_v63 }
 0x702   :  { %v578_v55 = vrot.slane %v577_v54, 4 }
 0x704   :  { %v579_v56 = vadd.f32 %v578_v55, %v577_v54 }
 0x706   :  { %v580_v57 = vrot.slane %v579_v56, 2 }
 0x708   :  { %v581_v58 = vadd.f32 %v580_v57, %v579_v56 }
 0x70a   :  { %v582_v61 = vrot.slane %v581_v58, 1 }
 0x70c   :  { %v583_v59 = vadd.f32 %v582_v61, %v581_v58 }
 0x70e   :  { %584 = vrot.lane.b32.xlu0 %v583_v59, %s874_s24 }
 0x780   :  { %v585_v2 = vpop.permute.xlu0 %584 }
 0x781   :  { %v586_v4 = vadd.f32 %v585_v2, %v583_v59 }
 0x783   :  { %587 = vrot.lane.b32.xlu1 %v586_v4, %s878_s3 }
 0x7f5   :  { %v588_v3 = vpop.permute.xlu1 %587 }
 0x7f6   :  { %v589_v5 = vadd.f32 %v588_v3, %v586_v4 }
 0x7f8   :  { %590 = vrot.lane.b32.xlu2 %v589_v5, %s879_s8 }
 0x852   :  { %v591_v6 = vpop.permute.xlu2 %590 }
 0x853   :  { %v592_v7 = vadd.f32 %v591_v6, %v589_v5 }
 0x855   :  { %593 = vrot.lane.b32.xlu0 %v592_v7, %s880_s9 }
 0x8c7   :  { %v594_v12 = vpop.permute.xlu0 %593 }
 0x8c8   :  { %v595_v8 = vadd.f32 %v594_v12, %v592_v7 }
 0x8ca   :  { %v596_v9 = vmul.f32 0.001953125, %v595_v8 }
 0x8cc   :  { %v597_v10 = vadd.f32 1e-05, %v596_v9  ;;  %v614_v22 = vrot.slane %v596_v9, 6 }
 0x8ce   :  { %740 = vrsqrt.f32 %v597_v10  ;;  %vm604_vm10 = vweird.f32 %v597_v10 }
 0x8d4   :  { %v741_v11 = vpop.eup %740 }
 0x8d5   :  { %v599_v13 = vmul.f32 %v741_v11, %v597_v10  ;;  %vm605_vm9 = vweird.f32 %v741_v11 }
 0x8d6   :  { %vm606_vm11 = vmor %vm604_vm10, %vm605_vm9 }
 0x8d7   :  { %v600_v14 = vmul.f32 %v741_v11, %v599_v13 }
 0x8d9   :  { %v601_v16 = vmul.f32 0.5, %v600_v14 }
 0x8db   :  { %v602_v17 = vsub.f32 1.5, %v601_v16 }
 0x8dd   :  { %v603_v18 = vmul.f32 %v741_v11, %v602_v17 }
 0x8df   :  { %v607_v19 = vsel %vm606_vm11, %v741_v11, %v603_v18 }
 0x8e0   :  { %v609_v20 = vrot.slane %v607_v19, 6 }
 0x8e2   :  { %v611_v41 = vmul.f32 %v609_v20, %v1062_v27 }
 0x8e4   :  { %v612_v21 = vmul.f32 %v611_v41, %v611_v41  ;;  %v620_v32 = vmul.f32 %v618_v29, %v611_v41 }
 0x8e6   :  { %v616_v15 = vmul.f32 %v614_v22, %v612_v21 }
 0x8e8   :  { %v621_v24 = vadd.f32 1e-05, %v616_v15 }
 0x8ea   :  { %742 = vrsqrt.f32 %v621_v24  ;;  %vm628_vm13 = vweird.f32 %v621_v24 }
 0x8f0   :  { %v743_v25 = vpop.eup %742 }
 0x8f1   :  { %v623_v23 = vmul.f32 %v743_v25, %v621_v24  ;;  %vm629_vm12 = vweird.f32 %v743_v25 }
 0x8f2   :  { %vm630_vm14 = vmor %vm628_vm13, %vm629_vm12 }
 0x8f3   :  { %v624_v26 = vmul.f32 %v743_v25, %v623_v23 }
 0x8f5   :  { %v625_v28 = vmul.f32 0.5, %v624_v26 }
 0x8f7   :  { %v626_v31 = vsub.f32 1.5, %v625_v28 }
 0x8f9   :  { %v627_v30 = vmul.f32 %v743_v25, %v626_v31 }
 0x8fb   :  { %v631_v33 = vsel %vm630_vm14, %v743_v25, %v627_v30 }
 0x8fc   :  { %v632_v34 = vmul.f32 %v631_v33, %v620_v32 }
 0x8fe   :  { %v633_v36 = vperm.slane %v632_v34, 2 }
 0x900   :  { %v634_v37 = vmul.f32 %v633_v36, %v1100_v48  ;;  %v635_v38 = vmul.f32 %v633_v36, %v1102_v49  ;;  %v636_v42 = vmul.f32 %v633_v36, %v1104_v50  ;;  %v637_v44 = vmul.f32 %v633_v36, %v1106_v51 }
 0x902   :  { %v639_v45 = vadd.f32 %v638_v35, %v634_v37  ;;  %v640_v46 = vadd.f32 %v638_v35, %v635_v38  ;;  %v641_v47 = vadd.f32 %v638_v35, %v636_v42  ;;  %v642_v60 = vadd.f32 %v638_v35, %v637_v44 }
 0x904   :  { %v643_v52 = vadd.f32 %v639_v45, %v928_v39  ;;  %v644_v0 = vadd.f32 %v640_v46, %v930_v40  ;;  %v645_v53 = vadd.f32 %v641_v47, %v952_v62  ;;  %v646_v27 = vadd.f32 %v642_v60, %v934_v43 }
 0x906   :  { %v647_v63 = vmax.f32 %v643_v52, 0.0  ;;  %v648_v48 = vmax.f32 %v644_v0, 0.0  ;;  %v649_v1 = vmax.f32 %v645_v53, 0.0  ;;  %v650_v49 = vmax.f32 %v646_v27, 0.0 }
 0x908   :  { %651 = vst [vmem:[#allocation10] sm:$0xff] %v647_v63 }
 0x909   :  { %652 = vst [vmem:[#allocation10 + $0x8] sm:$0xff] %v648_v48 }
 0x90a   :  { %653 = vst [vmem:[#allocation10 + $0x10] sm:$0xff] %v649_v1 }
 0x90b   :  { %654 = vst [vmem:[#allocation10 + $0x18] sm:$0xff] %v650_v49 }
 0x90c   :  { %667 = dma.vmem_to_hbm [thread:$0]  %s660_s11, 512, %s662_s14, [#allocation4], %s873_s23, %s873_s23, %s874_s24  }
 0x90d   :  { %870 = dma.done.wait [#allocation4], 512  }
 0x90e   :  { %871 = vsyncadd [#allocation4], 4294966784 }
 0x90f   :  { %672 = vsyncpa [#allocation3], 1 }
 0x910   :  { %673 = vsyncpa [#allocation6], 1 }
 0x911   :  { %674 = vsyncpa [#allocation9], 1 }
 0x912   :  { %675 = vsyncpa [#allocation4], 1 }

</bundles_post_ra>
